<compile_context>
chip_gen: v7x
topology: tpu7x:2x2x1
jax: 0.10.0
libtpu: 0.0.40
codegen_flags: <defaults>
</compile_context>

<pallas_src>
import functools

import jax
import jax.numpy as jnp
import numpy as np
from jax import lax
from jax.experimental import pallas as pl
from jax.experimental.pallas import tpu as pltpu

KSIZE = 7          # conv kernel size
PAD = 3            # conv padding
POOL_K = 5         # maxpool kernel size
POOL_PAD = 2       # maxpool padding
LANE = 128         # TPU lane width
SUB = 8            # f32 sublane multiple


def _round_up(x, m):
    return (x + m - 1) // m * m


# ----------------------------------------------------------------------------
# Fused kernel: conv1+BN+ReLU -> conv2+BN+ReLU -> (optional) maxpool
# ----------------------------------------------------------------------------
def _fused_kernel(xp_ref, w1_ref, b1_ref, w2_ref, b2_ref, *out_refs,
                  length, cout, ifpool, poolstride):
    """One batch element, (channels, length) layout (L on the lane axis).

    The length axis carries halo lanes so every stage reads its zero padding
    from shifted lane slices of an already-loaded value:

        xp_ref : (1, Cin_p,  W + 16)   x data anchored at lane 8
        h      :    (Cout_p, W + 10)   conv1 output anchored at lane 5
        y      :    (Cout_p, W + 4)    conv2 output anchored at lane 2
    """
    out_ref = out_refs[0]
    cout_p = w1_ref.shape[1]
    wx = xp_ref.shape[2]
    W = wx - 2 * (2 * PAD + POOL_PAD)      # lane-padded working width (mult of 128)
    wh = W + 2 * (PAD + POOL_PAD)          # conv1 output width
    wy = W + 2 * POOL_PAD                  # conv2 output width

    def conv(x_val, w_ref, b_ref, out_w):
        # 7 shifted MXU matmuls on an already-loaded (C, lanes) tile.
        acc = jnp.zeros((cout_p, out_w), jnp.float32)
        for k in range(KSIZE):
            acc = acc + jnp.dot(w_ref[k], x_val[:, k:k + out_w],
                                preferred_element_type=jnp.float32)
        return jnp.maximum(acc + b_ref[...], 0.0)

    xw = xp_ref[0]                                          # (Cin_p, W+16)

    # conv1 + folded BN + ReLU.  Zero everything outside the valid L lanes so
    # the halo acts as conv2's zero padding (bias+ReLU would otherwise leak).
    h = conv(xw, w1_ref, b1_ref, wh)                        # (Cout_p, W+10)
    lane_h = lax.broadcasted_iota(jnp.int32, (cout_p, wh), 1)
    h = jnp.where((lane_h >= PAD + POOL_PAD) &
                  (lane_h < PAD + POOL_PAD + length), h, 0.0)

    # conv2 + folded BN + ReLU (anchored at lane POOL_PAD for the pool).
    y = conv(h, w2_ref, b2_ref, wy)                         # (Cout_p, W+4)
    out_ref[0] = y[:cout, POOL_PAD:POOL_PAD + length].astype(out_ref.dtype)

    if ifpool:
        pool_ref = out_refs[1]
        lout = pool_ref.shape[2]
        lane_y = lax.broadcasted_iota(jnp.int32, (cout_p, wy), 1)
        # ReLU guarantees y >= 0, so zero padding is equivalent to -inf here.
        ym = jnp.where((lane_y >= POOL_PAD) &
                       (lane_y < POOL_PAD + length), y, 0.0)
        # stride-1 sliding max (lane-dense, no strided reads) ...
        m = ym[:, 0:W]
        for t in range(1, POOL_K):
            m = jnp.maximum(m, ym[:, t:t + W])
        # ... then downsample by `poolstride` with a tiny selection matmul.
        rows = lax.broadcasted_iota(jnp.int32, (W, lout), 0)
        cols = lax.broadcasted_iota(jnp.int32, (W, lout), 1)
        sel = (rows == poolstride * cols).astype(jnp.float32)
        pooled = jnp.dot(m, sel, preferred_element_type=jnp.float32)
        pool_ref[0] = pooled[:cout].astype(pool_ref.dtype)


# ----------------------------------------------------------------------------
# Wrapper
# ----------------------------------------------------------------------------
def conv_downsample_forward(x_ncl, params, *, ifpool=False, poolstride=2):
    """x_ncl: (B, C_in, L) -- PyTorch NCL layout (kept as-is: L on lanes)."""
    B, cin, L = x_ncl.shape
    c1, c2 = params["c1"], params["c2"]
    cout = c1["out_ch"]
    cout_p, cin_p = c1["w_koi"].shape[1], c1["w_koi"].shape[2]

    W = _round_up(L, LANE)                 # lane-padded working width
    ax = 2 * PAD + POOL_PAD                # input halo / anchor (= 8)
    wx = W + 2 * ax

    # pad channels to a sublane multiple and give L its halo (all zeros).
    xp = jnp.pad(x_ncl, ((0, 0), (0, cin_p - cin), (ax, wx - L - ax)))

    lout = (L + 2 * POOL_PAD - POOL_K) // poolstride + 1
    kernel = functools.partial(_fused_kernel, length=L, cout=cout,
                               ifpool=ifpool, poolstride=poolstride)

    if ifpool:
        out_shape = (jax.ShapeDtypeStruct((B, cout, L), jnp.float32),
                     jax.ShapeDtypeStruct((B, cout, lout), jnp.float32))
        out_specs = (pl.BlockSpec((1, cout, L), lambda b: (b, 0, 0)),
                     pl.BlockSpec((1, cout, lout), lambda b: (b, 0, 0)))
    else:
        out_shape = jax.ShapeDtypeStruct((B, cout, L), jnp.float32)
        out_specs = pl.BlockSpec((1, cout, L), lambda b: (b, 0, 0))

    result = pl.pallas_call(
        kernel,
        out_shape=out_shape,
        grid=(B,),
        in_specs=[
            pl.BlockSpec((1, cin_p, wx), lambda b: (b, 0, 0)),
            pl.BlockSpec((KSIZE, cout_p, cin_p), lambda b: (0, 0, 0)),
            pl.BlockSpec((cout_p, 1), lambda b: (0, 0)),
            pl.BlockSpec((KSIZE, cout_p, cout_p), lambda b: (0, 0, 0)),
            pl.BlockSpec((cout_p, 1), lambda b: (0, 0)),
        ],
        out_specs=out_specs,
        compiler_params=pltpu.CompilerParams(
            dimension_semantics=("parallel",)),
    )(xp, c1["w_koi"], c1["b_col"], c2["w_koi"], c2["b_col"])

    if ifpool:
        return result[0], result[1]
    return result


# ----------------------------------------------------------------------------
# Parameter construction (deterministic, fresh-module-like) + BN folding
# ----------------------------------------------------------------------------
def _fold_and_pack(w_oik, b, gamma, beta, run_mean, run_var,
                   cin_p, cout_p, eps=1e-5):
    """Fold eval-mode BN into conv weight/bias; pad channels; -> (K, O, I)."""
    cout, cin, _ = w_oik.shape
    scale = gamma / jnp.sqrt(run_var + eps)
    w = w_oik * scale[:, None, None]
    bias = (b - run_mean) * scale + beta
    w = jnp.pad(w, ((0, cout_p - cout), (0, cin_p - cin), (0, 0)))
    bias = jnp.pad(bias, (0, cout_p - cout))
    w_koi = jnp.transpose(w, (2, 0, 1))          # (K, Cout_p, Cin_p)
    return w_koi, bias[:, None]                  # bias as (Cout_p, 1) column


def init_params(key, in_ch, out_ch):
    ks = jax.random.split(key, 8)
    cin_p = _round_up(in_ch, SUB)
    cout_p = _round_up(out_ch, SUB)

    def conv_block(kw, kb, kg, kbeta, cin, cout, cin_pad, cout_pad):
        w = jax.random.normal(kw, (cout, cin, KSIZE), jnp.float32)
        w = w / np.sqrt(cin * KSIZE)                    # Conv1d weight (O, I, K)
        b = 0.1 * jax.random.normal(kb, (cout,), jnp.float32)
        gamma = 1.0 + 0.1 * jax.random.normal(kg, (cout,), jnp.float32)
        beta = 0.1 * jax.random.normal(kbeta, (cout,), jnp.float32)
        run_mean = jnp.zeros((cout,), jnp.float32)      # fresh BN running stats
        run_var = jnp.ones((cout,), jnp.float32)
        w_koi, b_col = _fold_and_pack(w, b, gamma, beta, run_mean, run_var,
                                      cin_pad, cout_pad)
        return dict(w_oik=w, b=b, gamma=gamma, beta=beta,
                    w_koi=w_koi, b_col=b_col, out_ch=cout)

    return dict(
        c1=conv_block(ks[0], ks[1], ks[2], ks[3], in_ch, out_ch, cin_p, cout_p),
        c2=conv_block(ks[4], ks[5], ks[6], ks[7], out_ch, out_ch, cout_p, cout_p),
    )


# ----------------------------------------------------------------------------
# Pure-JAX reference (correctness check)
# ----------------------------------------------------------------------------
def _ref_conv_bn_relu(x_ncl, blk):
    y = lax.conv_general_dilated(
        x_ncl, blk["w_oik"], window_strides=(1,), padding=((PAD, PAD),),
        dimension_numbers=("NCH", "OIH", "NCH"))
    y = y + blk["b"][None, :, None]
    y = y / jnp.sqrt(1.0 + 1e-5) * blk["gamma"][None, :, None] \
        + blk["beta"][None, :, None]
    return jnp.maximum(y, 0.0)


def _ref_forward(x_ncl, params, *, ifpool, poolstride):
    h = _ref_conv_bn_relu(x_ncl, params["c1"])
    h = _ref_conv_bn_relu(h, params["c2"])
    if ifpool:
        p = lax.reduce_window(
            h, -jnp.inf, lax.max,
            window_dimensions=(1, 1, POOL_K),
            window_strides=(1, 1, poolstride),
            padding=((0, 0), (0, 0), (POOL_PAD, POOL_PAD)))
        return h, p
    return h


# ----------------------------------------------------------------------------
if __name__ == "__main__":
    B, IN_CH, OUT_CH, L = 2, 4, 8, 64
    key = jax.random.PRNGKey(0)
    kx, kp = jax.random.split(key)

    x = jax.random.normal(kx, (B, IN_CH, L), jnp.float32)   # NCL, like PyTorch
    params = init_params(kp, IN_CH, OUT_CH)

    out, poolout = conv_downsample_forward(x, params, ifpool=True, poolstride=2)
    out = jax.block_until_ready(out)
    poolout = jax.block_until_ready(poolout)

    ref_out, ref_pool = _ref_forward(x, params, ifpool=True, poolstride=2)
    np.testing.assert_allclose(np.asarray(out), np.asarray(ref_out),
                               rtol=1e-3, atol=1e-3)
    np.testing.assert_allclose(np.asarray(poolout), np.asarray(ref_pool),
                               rtol=1e-3, atol=1e-3)

    # also exercise the no-pool path
    out_only = jax.block_until_ready(
        conv_downsample_forward(x, params, ifpool=False))
    np.testing.assert_allclose(np.asarray(out_only), np.asarray(ref_out),
                               rtol=1e-3, atol=1e-3)

    assert out.shape == (B, OUT_CH, L)
    assert poolout.shape == (B, OUT_CH, (L + 2 * POOL_PAD - POOL_K) // 2 + 1)
    print("KERNEL_OK")
</pallas_src>

<mosaic_0001>
module attributes {stable_mosaic.version = 11 : i64} {
  func.func @_fused_kernel(%arg0: i32, %arg1: memref<1x8x144xf32, #tpu.memory_space<vmem>>, %arg2: memref<7x8x8xf32, #tpu.memory_space<vmem>>, %arg3: memref<8x1xf32, #tpu.memory_space<vmem>>, %arg4: memref<7x8x8xf32, #tpu.memory_space<vmem>>, %arg5: memref<8x1xf32, #tpu.memory_space<vmem>>, %arg6: memref<1x8x64xf32, #tpu.memory_space<vmem>>, %arg7: memref<1x8x32xf32, #tpu.memory_space<vmem>>) attributes {dimension_semantics = [#tpu.dimension_semantics<parallel>], iteration_bounds = array<i64: 2>, scalar_prefetch = 0 : i64, scratch_operands = 0 : i64, tpu.core_type = #tpu.core_type<tc>, window_params = [{transform_indices = @transform_0, window_bounds = array<i64: 1, 8, 144>}, {pipeline_mode = #tpu.pipeline_mode<synchronous>, transform_indices = @transform_1, window_bounds = array<i64: 7, 8, 8>}, {pipeline_mode = #tpu.pipeline_mode<synchronous>, transform_indices = @transform_2, window_bounds = array<i64: 8, 1>}, {pipeline_mode = #tpu.pipeline_mode<synchronous>, transform_indices = @transform_3, window_bounds = array<i64: 7, 8, 8>}, {pipeline_mode = #tpu.pipeline_mode<synchronous>, transform_indices = @transform_4, window_bounds = array<i64: 8, 1>}, {transform_indices = @transform_5, window_bounds = array<i64: 1, 8, 64>}, {transform_indices = @transform_6, window_bounds = array<i64: 1, 8, 32>}]} {
    %c0 = arith.constant 0 : index
    %c0_0 = arith.constant 0 : index
    %c0_1 = arith.constant 0 : index
    %0 = vector.load %arg1[%c0, %c0_0, %c0_1] : memref<1x8x144xf32, #tpu.memory_space<vmem>>, vector<1x8x144xf32>
    %1 = vector.shape_cast %0 : vector<1x8x144xf32> to vector<8x144xf32>
    %cst = arith.constant 0.000000e+00 : f32
    %2 = vector.broadcast %cst : f32 to vector<8x138xf32>
    %c0_2 = arith.constant 0 : index
    %c0_3 = arith.constant 0 : index
    %c0_4 = arith.constant 0 : index
    %3 = vector.load %arg2[%c0_2, %c0_3, %c0_4] : memref<7x8x8xf32, #tpu.memory_space<vmem>>, vector<1x8x8xf32>
    %4 = vector.shape_cast %3 : vector<1x8x8xf32> to vector<8x8xf32>
    %5 = vector.extract_strided_slice %1 {offsets = [0, 0], sizes = [8, 138], strides = [1, 1]} : vector<8x144xf32> to vector<8x138xf32>
    %cst_5 = arith.constant dense<0.000000e+00> : vector<8x138xf32>
    %6 = tpu.matmul %4, %5, %cst_5 {dimension_numbers = #tpu.dot_dimension_numbers<[1], [0], [0], [1], [0, 0, 1, 1], [], []>} : vector<8x8xf32>, vector<8x138xf32>, vector<8x138xf32> -> vector<8x138xf32>
    %7 = arith.addf %2, %6 : vector<8x138xf32>
    %c1 = arith.constant 1 : index
    %c0_6 = arith.constant 0 : index
    %c0_7 = arith.constant 0 : index
    %8 = vector.load %arg2[%c1, %c0_6, %c0_7] : memref<7x8x8xf32, #tpu.memory_space<vmem>>, vector<1x8x8xf32>
    %9 = vector.shape_cast %8 : vector<1x8x8xf32> to vector<8x8xf32>
    %10 = vector.extract_strided_slice %1 {offsets = [0, 1], sizes = [8, 138], strides = [1, 1]} : vector<8x144xf32> to vector<8x138xf32>
    %cst_8 = arith.constant dense<0.000000e+00> : vector<8x138xf32>
    %11 = tpu.matmul %9, %10, %cst_8 {dimension_numbers = #tpu.dot_dimension_numbers<[1], [0], [0], [1], [0, 0, 1, 1], [], []>} : vector<8x8xf32>, vector<8x138xf32>, vector<8x138xf32> -> vector<8x138xf32>
    %12 = arith.addf %7, %11 : vector<8x138xf32>
    %c2 = arith.constant 2 : index
    %c0_9 = arith.constant 0 : index
    %c0_10 = arith.constant 0 : index
    %13 = vector.load %arg2[%c2, %c0_9, %c0_10] : memref<7x8x8xf32, #tpu.memory_space<vmem>>, vector<1x8x8xf32>
    %14 = vector.shape_cast %13 : vector<1x8x8xf32> to vector<8x8xf32>
    %15 = vector.extract_strided_slice %1 {offsets = [0, 2], sizes = [8, 138], strides = [1, 1]} : vector<8x144xf32> to vector<8x138xf32>
    %cst_11 = arith.constant dense<0.000000e+00> : vector<8x138xf32>
    %16 = tpu.matmul %14, %15, %cst_11 {dimension_numbers = #tpu.dot_dimension_numbers<[1], [0], [0], [1], [0, 0, 1, 1], [], []>} : vector<8x8xf32>, vector<8x138xf32>, vector<8x138xf32> -> vector<8x138xf32>
    %17 = arith.addf %12, %16 : vector<8x138xf32>
    %c3 = arith.constant 3 : index
    %c0_12 = arith.constant 0 : index
    %c0_13 = arith.constant 0 : index
    %18 = vector.load %arg2[%c3, %c0_12, %c0_13] : memref<7x8x8xf32, #tpu.memory_space<vmem>>, vector<1x8x8xf32>
    %19 = vector.shape_cast %18 : vector<1x8x8xf32> to vector<8x8xf32>
    %20 = vector.extract_strided_slice %1 {offsets = [0, 3], sizes = [8, 138], strides = [1, 1]} : vector<8x144xf32> to vector<8x138xf32>
    %cst_14 = arith.constant dense<0.000000e+00> : vector<8x138xf32>
    %21 = tpu.matmul %19, %20, %cst_14 {dimension_numbers = #tpu.dot_dimension_numbers<[1], [0], [0], [1], [0, 0, 1, 1], [], []>} : vector<8x8xf32>, vector<8x138xf32>, vector<8x138xf32> -> vector<8x138xf32>
    %22 = arith.addf %17, %21 : vector<8x138xf32>
    %c4 = arith.constant 4 : index
    %c0_15 = arith.constant 0 : index
    %c0_16 = arith.constant 0 : index
    %23 = vector.load %arg2[%c4, %c0_15, %c0_16] : memref<7x8x8xf32, #tpu.memory_space<vmem>>, vector<1x8x8xf32>
    %24 = vector.shape_cast %23 : vector<1x8x8xf32> to vector<8x8xf32>
    %25 = vector.extract_strided_slice %1 {offsets = [0, 4], sizes = [8, 138], strides = [1, 1]} : vector<8x144xf32> to vector<8x138xf32>
    %cst_17 = arith.constant dense<0.000000e+00> : vector<8x138xf32>
    %26 = tpu.matmul %24, %25, %cst_17 {dimension_numbers = #tpu.dot_dimension_numbers<[1], [0], [0], [1], [0, 0, 1, 1], [], []>} : vector<8x8xf32>, vector<8x138xf32>, vector<8x138xf32> -> vector<8x138xf32>
    %27 = arith.addf %22, %26 : vector<8x138xf32>
    %c5 = arith.constant 5 : index
    %c0_18 = arith.constant 0 : index
    %c0_19 = arith.constant 0 : index
    %28 = vector.load %arg2[%c5, %c0_18, %c0_19] : memref<7x8x8xf32, #tpu.memory_space<vmem>>, vector<1x8x8xf32>
    %29 = vector.shape_cast %28 : vector<1x8x8xf32> to vector<8x8xf32>
    %30 = vector.extract_strided_slice %1 {offsets = [0, 5], sizes = [8, 138], strides = [1, 1]} : vector<8x144xf32> to vector<8x138xf32>
    %cst_20 = arith.constant dense<0.000000e+00> : vector<8x138xf32>
    %31 = tpu.matmul %29, %30, %cst_20 {dimension_numbers = #tpu.dot_dimension_numbers<[1], [0], [0], [1], [0, 0, 1, 1], [], []>} : vector<8x8xf32>, vector<8x138xf32>, vector<8x138xf32> -> vector<8x138xf32>
    %32 = arith.addf %27, %31 : vector<8x138xf32>
    %c6 = arith.constant 6 : index
    %c0_21 = arith.constant 0 : index
    %c0_22 = arith.constant 0 : index
    %33 = vector.load %arg2[%c6, %c0_21, %c0_22] : memref<7x8x8xf32, #tpu.memory_space<vmem>>, vector<1x8x8xf32>
    %34 = vector.shape_cast %33 : vector<1x8x8xf32> to vector<8x8xf32>
    %35 = vector.extract_strided_slice %1 {offsets = [0, 6], sizes = [8, 138], strides = [1, 1]} : vector<8x144xf32> to vector<8x138xf32>
    %cst_23 = arith.constant dense<0.000000e+00> : vector<8x138xf32>
    %36 = tpu.matmul %34, %35, %cst_23 {dimension_numbers = #tpu.dot_dimension_numbers<[1], [0], [0], [1], [0, 0, 1, 1], [], []>} : vector<8x8xf32>, vector<8x138xf32>, vector<8x138xf32> -> vector<8x138xf32>
    %37 = arith.addf %32, %36 : vector<8x138xf32>
    %c0_24 = arith.constant 0 : index
    %c0_25 = arith.constant 0 : index
    %38 = vector.load %arg3[%c0_24, %c0_25] : memref<8x1xf32, #tpu.memory_space<vmem>>, vector<8x1xf32>
    %39 = vector.broadcast %38 : vector<8x1xf32> to vector<8x138xf32>
    %40 = arith.addf %37, %39 : vector<8x138xf32>
    %cst_26 = arith.constant 0.000000e+00 : f32
    %41 = vector.broadcast %cst_26 : f32 to vector<8x138xf32>
    %42 = arith.maximumf %40, %41 : vector<8x138xf32>
    %43 = tpu.iota {dimensions = array<i32: 1>} : vector<8x138xi32>
    %c5_i32 = arith.constant 5 : i32
    %44 = vector.broadcast %c5_i32 : i32 to vector<8x138xi32>
    %45 = arith.cmpi sge, %43, %44 : vector<8x138xi32>
    %c69_i32 = arith.constant 69 : i32
    %46 = vector.broadcast %c69_i32 : i32 to vector<8x138xi32>
    %47 = arith.cmpi slt, %43, %46 : vector<8x138xi32>
    %48 = arith.andi %45, %47 : vector<8x138xi1>
    %cst_27 = arith.constant 0.000000e+00 : f32
    %49 = vector.broadcast %cst_27 : f32 to vector<8x138xf32>
    %50 = arith.select %48, %42, %49 : vector<8x138xi1>, vector<8x138xf32>
    %cst_28 = arith.constant 0.000000e+00 : f32
    %51 = vector.broadcast %cst_28 : f32 to vector<8x132xf32>
    %c0_29 = arith.constant 0 : index
    %c0_30 = arith.constant 0 : index
    %c0_31 = arith.constant 0 : index
    %52 = vector.load %arg4[%c0_29, %c0_30, %c0_31] : memref<7x8x8xf32, #tpu.memory_space<vmem>>, vector<1x8x8xf32>
    %53 = vector.shape_cast %52 : vector<1x8x8xf32> to vector<8x8xf32>
    %54 = vector.extract_strided_slice %50 {offsets = [0, 0], sizes = [8, 132], strides = [1, 1]} : vector<8x138xf32> to vector<8x132xf32>
    %cst_32 = arith.constant dense<0.000000e+00> : vector<8x132xf32>
    %55 = tpu.matmul %53, %54, %cst_32 {dimension_numbers = #tpu.dot_dimension_numbers<[1], [0], [0], [1], [0, 0, 1, 1], [], []>} : vector<8x8xf32>, vector<8x132xf32>, vector<8x132xf32> -> vector<8x132xf32>
    %56 = arith.addf %51, %55 : vector<8x132xf32>
    %c1_33 = arith.constant 1 : index
    %c0_34 = arith.constant 0 : index
    %c0_35 = arith.constant 0 : index
    %57 = vector.load %arg4[%c1_33, %c0_34, %c0_35] : memref<7x8x8xf32, #tpu.memory_space<vmem>>, vector<1x8x8xf32>
    %58 = vector.shape_cast %57 : vector<1x8x8xf32> to vector<8x8xf32>
    %59 = vector.extract_strided_slice %50 {offsets = [0, 1], sizes = [8, 132], strides = [1, 1]} : vector<8x138xf32> to vector<8x132xf32>
    %cst_36 = arith.constant dense<0.000000e+00> : vector<8x132xf32>
    %60 = tpu.matmul %58, %59, %cst_36 {dimension_numbers = #tpu.dot_dimension_numbers<[1], [0], [0], [1], [0, 0, 1, 1], [], []>} : vector<8x8xf32>, vector<8x132xf32>, vector<8x132xf32> -> vector<8x132xf32>
    %61 = arith.addf %56, %60 : vector<8x132xf32>
    %c2_37 = arith.constant 2 : index
    %c0_38 = arith.constant 0 : index
    %c0_39 = arith.constant 0 : index
    %62 = vector.load %arg4[%c2_37, %c0_38, %c0_39] : memref<7x8x8xf32, #tpu.memory_space<vmem>>, vector<1x8x8xf32>
    %63 = vector.shape_cast %62 : vector<1x8x8xf32> to vector<8x8xf32>
    %64 = vector.extract_strided_slice %50 {offsets = [0, 2], sizes = [8, 132], strides = [1, 1]} : vector<8x138xf32> to vector<8x132xf32>
    %cst_40 = arith.constant dense<0.000000e+00> : vector<8x132xf32>
    %65 = tpu.matmul %63, %64, %cst_40 {dimension_numbers = #tpu.dot_dimension_numbers<[1], [0], [0], [1], [0, 0, 1, 1], [], []>} : vector<8x8xf32>, vector<8x132xf32>, vector<8x132xf32> -> vector<8x132xf32>
    %66 = arith.addf %61, %65 : vector<8x132xf32>
    %c3_41 = arith.constant 3 : index
    %c0_42 = arith.constant 0 : index
    %c0_43 = arith.constant 0 : index
    %67 = vector.load %arg4[%c3_41, %c0_42, %c0_43] : memref<7x8x8xf32, #tpu.memory_space<vmem>>, vector<1x8x8xf32>
    %68 = vector.shape_cast %67 : vector<1x8x8xf32> to vector<8x8xf32>
    %69 = vector.extract_strided_slice %50 {offsets = [0, 3], sizes = [8, 132], strides = [1, 1]} : vector<8x138xf32> to vector<8x132xf32>
    %cst_44 = arith.constant dense<0.000000e+00> : vector<8x132xf32>
    %70 = tpu.matmul %68, %69, %cst_44 {dimension_numbers = #tpu.dot_dimension_numbers<[1], [0], [0], [1], [0, 0, 1, 1], [], []>} : vector<8x8xf32>, vector<8x132xf32>, vector<8x132xf32> -> vector<8x132xf32>
    %71 = arith.addf %66, %70 : vector<8x132xf32>
    %c4_45 = arith.constant 4 : index
    %c0_46 = arith.constant 0 : index
    %c0_47 = arith.constant 0 : index
    %72 = vector.load %arg4[%c4_45, %c0_46, %c0_47] : memref<7x8x8xf32, #tpu.memory_space<vmem>>, vector<1x8x8xf32>
    %73 = vector.shape_cast %72 : vector<1x8x8xf32> to vector<8x8xf32>
    %74 = vector.extract_strided_slice %50 {offsets = [0, 4], sizes = [8, 132], strides = [1, 1]} : vector<8x138xf32> to vector<8x132xf32>
    %cst_48 = arith.constant dense<0.000000e+00> : vector<8x132xf32>
    %75 = tpu.matmul %73, %74, %cst_48 {dimension_numbers = #tpu.dot_dimension_numbers<[1], [0], [0], [1], [0, 0, 1, 1], [], []>} : vector<8x8xf32>, vector<8x132xf32>, vector<8x132xf32> -> vector<8x132xf32>
    %76 = arith.addf %71, %75 : vector<8x132xf32>
    %c5_49 = arith.constant 5 : index
    %c0_50 = arith.constant 0 : index
    %c0_51 = arith.constant 0 : index
    %77 = vector.load %arg4[%c5_49, %c0_50, %c0_51] : memref<7x8x8xf32, #tpu.memory_space<vmem>>, vector<1x8x8xf32>
    %78 = vector.shape_cast %77 : vector<1x8x8xf32> to vector<8x8xf32>
    %79 = vector.extract_strided_slice %50 {offsets = [0, 5], sizes = [8, 132], strides = [1, 1]} : vector<8x138xf32> to vector<8x132xf32>
    %cst_52 = arith.constant dense<0.000000e+00> : vector<8x132xf32>
    %80 = tpu.matmul %78, %79, %cst_52 {dimension_numbers = #tpu.dot_dimension_numbers<[1], [0], [0], [1], [0, 0, 1, 1], [], []>} : vector<8x8xf32>, vector<8x132xf32>, vector<8x132xf32> -> vector<8x132xf32>
    %81 = arith.addf %76, %80 : vector<8x132xf32>
    %c6_53 = arith.constant 6 : index
    %c0_54 = arith.constant 0 : index
    %c0_55 = arith.constant 0 : index
    %82 = vector.load %arg4[%c6_53, %c0_54, %c0_55] : memref<7x8x8xf32, #tpu.memory_space<vmem>>, vector<1x8x8xf32>
    %83 = vector.shape_cast %82 : vector<1x8x8xf32> to vector<8x8xf32>
    %84 = vector.extract_strided_slice %50 {offsets = [0, 6], sizes = [8, 132], strides = [1, 1]} : vector<8x138xf32> to vector<8x132xf32>
    %cst_56 = arith.constant dense<0.000000e+00> : vector<8x132xf32>
    %85 = tpu.matmul %83, %84, %cst_56 {dimension_numbers = #tpu.dot_dimension_numbers<[1], [0], [0], [1], [0, 0, 1, 1], [], []>} : vector<8x8xf32>, vector<8x132xf32>, vector<8x132xf32> -> vector<8x132xf32>
    %86 = arith.addf %81, %85 : vector<8x132xf32>
    %c0_57 = arith.constant 0 : index
    %c0_58 = arith.constant 0 : index
    %87 = vector.load %arg5[%c0_57, %c0_58] : memref<8x1xf32, #tpu.memory_space<vmem>>, vector<8x1xf32>
    %88 = vector.broadcast %87 : vector<8x1xf32> to vector<8x132xf32>
    %89 = arith.addf %86, %88 : vector<8x132xf32>
    %cst_59 = arith.constant 0.000000e+00 : f32
    %90 = vector.broadcast %cst_59 : f32 to vector<8x132xf32>
    %91 = arith.maximumf %89, %90 : vector<8x132xf32>
    %92 = vector.extract_strided_slice %91 {offsets = [0, 2], sizes = [8, 64], strides = [1, 1]} : vector<8x132xf32> to vector<8x64xf32>
    %c0_60 = arith.constant 0 : index
    %c0_61 = arith.constant 0 : index
    %c0_62 = arith.constant 0 : index
    %93 = vector.load %arg6[%c0_60, %c0_61, %c0_62] : memref<1x8x64xf32, #tpu.memory_space<vmem>>, vector<1x8x64xf32>
    %94 = vector.shape_cast %93 : vector<1x8x64xf32> to vector<8x64xf32>
    %95 = vector.shape_cast %92 : vector<8x64xf32> to vector<1x8x64xf32>
    tpu.vector_store %arg6[%c0_60, %c0_61, %c0_62], %95 {strides = array<i32>} : memref<1x8x64xf32, #tpu.memory_space<vmem>>, vector<1x8x64xf32>,
    %96 = tpu.iota {dimensions = array<i32: 1>} : vector<8x132xi32>
    %c2_i32 = arith.constant 2 : i32
    %97 = vector.broadcast %c2_i32 : i32 to vector<8x132xi32>
    %98 = arith.cmpi sge, %96, %97 : vector<8x132xi32>
    %c66_i32 = arith.constant 66 : i32
    %99 = vector.broadcast %c66_i32 : i32 to vector<8x132xi32>
    %100 = arith.cmpi slt, %96, %99 : vector<8x132xi32>
    %101 = arith.andi %98, %100 : vector<8x132xi1>
    %cst_63 = arith.constant 0.000000e+00 : f32
    %102 = vector.broadcast %cst_63 : f32 to vector<8x132xf32>
    %103 = arith.select %101, %91, %102 : vector<8x132xi1>, vector<8x132xf32>
    %104 = vector.extract_strided_slice %103 {offsets = [0, 0], sizes = [8, 128], strides = [1, 1]} : vector<8x132xf32> to vector<8x128xf32>
    %105 = vector.extract_strided_slice %103 {offsets = [0, 1], sizes = [8, 128], strides = [1, 1]} : vector<8x132xf32> to vector<8x128xf32>
    %106 = arith.maximumf %104, %105 : vector<8x128xf32>
    %107 = vector.extract_strided_slice %103 {offsets = [0, 2], sizes = [8, 128], strides = [1, 1]} : vector<8x132xf32> to vector<8x128xf32>
    %108 = arith.maximumf %106, %107 : vector<8x128xf32>
    %109 = vector.extract_strided_slice %103 {offsets = [0, 3], sizes = [8, 128], strides = [1, 1]} : vector<8x132xf32> to vector<8x128xf32>
    %110 = arith.maximumf %108, %109 : vector<8x128xf32>
    %111 = vector.extract_strided_slice %103 {offsets = [0, 4], sizes = [8, 128], strides = [1, 1]} : vector<8x132xf32> to vector<8x128xf32>
    %112 = arith.maximumf %110, %111 : vector<8x128xf32>
    %113 = tpu.iota {dimensions = array<i32: 0>} : vector<128x32xi32>
    %114 = tpu.iota {dimensions = array<i32: 1>} : vector<128x32xi32>
    %c2_i32_64 = arith.constant 2 : i32
    %115 = vector.broadcast %c2_i32_64 : i32 to vector<128x32xi32>
    %116 = arith.muli %115, %114 : vector<128x32xi32>
    %117 = arith.cmpi eq, %113, %116 : vector<128x32xi32>
    %118 = arith.extui %117 : vector<128x32xi1> to vector<128x32xi32>
    %119 = arith.sitofp %118 : vector<128x32xi32> to vector<128x32xf32>
    %cst_65 = arith.constant dense<0.000000e+00> : vector<8x32xf32>
    %120 = tpu.matmul %112, %119, %cst_65 {dimension_numbers = #tpu.dot_dimension_numbers<[1], [0], [0], [1], [0, 0, 1, 1], [], []>} : vector<8x128xf32>, vector<128x32xf32>, vector<8x32xf32> -> vector<8x32xf32>
    %c0_66 = arith.constant 0 : index
    %c0_67 = arith.constant 0 : index
    %c0_68 = arith.constant 0 : index
    %121 = vector.load %arg7[%c0_66, %c0_67, %c0_68] : memref<1x8x32xf32, #tpu.memory_space<vmem>>, vector<1x8x32xf32>
    %122 = vector.shape_cast %121 : vector<1x8x32xf32> to vector<8x32xf32>
    %123 = vector.shape_cast %120 : vector<8x32xf32> to vector<1x8x32xf32>
    tpu.vector_store %arg7[%c0_66, %c0_67, %c0_68], %123 {strides = array<i32>} : memref<1x8x32xf32, #tpu.memory_space<vmem>>, vector<1x8x32xf32>,
    return
  }
  func.func @transform_0(%arg0: i32) -> (i32, i32, i32) {
    %c0_i32 = arith.constant 0 : i32
    %c0_i32_0 = arith.constant 0 : i32
    %c0_i32_1 = arith.constant 0 : i32
    return %arg0, %c0_i32, %c0_i32_0 : i32, i32, i32
  }
  func.func @transform_1(%arg0: i32) -> (i32, i32, i32) {
    %c0_i32 = arith.constant 0 : i32
    %c0_i32_0 = arith.constant 0 : i32
    %c0_i32_1 = arith.constant 0 : i32
    %c0_i32_2 = arith.constant 0 : i32
    return %c0_i32, %c0_i32_0, %c0_i32_1 : i32, i32, i32
  }
  func.func @transform_2(%arg0: i32) -> (i32, i32) {
    %c0_i32 = arith.constant 0 : i32
    %c0_i32_0 = arith.constant 0 : i32
    %c0_i32_1 = arith.constant 0 : i32
    return %c0_i32, %c0_i32_0 : i32, i32
  }
  func.func @transform_3(%arg0: i32) -> (i32, i32, i32) {
    %c0_i32 = arith.constant 0 : i32
    %c0_i32_0 = arith.constant 0 : i32
    %c0_i32_1 = arith.constant 0 : i32
    %c0_i32_2 = arith.constant 0 : i32
    return %c0_i32, %c0_i32_0, %c0_i32_1 : i32, i32, i32
  }
  func.func @transform_4(%arg0: i32) -> (i32, i32) {
    %c0_i32 = arith.constant 0 : i32
    %c0_i32_0 = arith.constant 0 : i32
    %c0_i32_1 = arith.constant 0 : i32
    return %c0_i32, %c0_i32_0 : i32, i32
  }
  func.func @transform_5(%arg0: i32) -> (i32, i32, i32) {
    %c0_i32 = arith.constant 0 : i32
    %c0_i32_0 = arith.constant 0 : i32
    %c0_i32_1 = arith.constant 0 : i32
    return %arg0, %c0_i32, %c0_i32_0 : i32, i32, i32
  }
  func.func @transform_6(%arg0: i32) -> (i32, i32, i32) {
    %c0_i32 = arith.constant 0 : i32
    %c0_i32_0 = arith.constant 0 : i32
    %c0_i32_1 = arith.constant 0 : i32
    return %arg0, %c0_i32, %c0_i32_0 : i32, i32, i32
  }
}

</mosaic_0001>

<bundles_post_ra>
// kernel: tpu_custom_call.1
= control target key start
LH: loop header
LB: loop body
LE: loop exit
PB: predicated region body
PF: predicated region fallthrough
CT: control target
= control target key end

     0   :  { %12 = vsyncpa [#allocation3], 0  ;;  %s2765_s0 = inlined_call_operand.hbm [shape: f32[2,8,144], index: 0, kind: input, shape index: {}]   ;;  %s2766_s1 = inlined_call_operand.hbm [shape: f32[7,8,8], index: 1, kind: input, shape index: {}]   ;;  %s2767_s2 = inlined_call_operand.vmem [shape: f32[8,1], index: 2, kind: input, shape index: {}]   ;;  %s2768_s3 = inlined_call_operand.hbm [shape: f32[7,8,8], index: 3, kind: input, shape index: {}]   ;;  %s2769_s4 = inlined_call_operand.vmem [shape: f32[8,1], index: 4, kind: input, shape index: {}]   ;;  %s2770_s5 = inlined_call_operand.hbm [shape: f32[2,8,64], index: 5, kind: output, shape index: {0}]   ;;  %s2771_s6 = inlined_call_operand.hbm [shape: f32[2,8,32], index: 6, kind: output, shape index: {1}]  }
   0x1   :  { %14 = vsyncpa [#allocation3 + $0x1], 0 }
   0x2   :  { %15 = vsyncpa [#allocation6], 0 }
   0x3   :  { %16 = vsyncpa [#allocation4], 0 }
   0x4   :  { %18 = vsyncpa [#allocation4 + $0x1], 0 }
   0x5   :  { %19 = vsyncpa [#allocation10], 0 }
   0x6   :  { %21 = vsyncpa [#allocation10 + $0x1], 0  ;;  %s2353_s21 = smov 0   ;;  %s2355_s22 = smov 0  }
   0x7   :  { %s2357_s23 = smov 0   ;;  %s2359_s24 = smov 0  }
   0x8 LB: > { %s2374_s25 = sadd.s32 4294967295, %s2298_s24   ;;  %s1853_s26 = sadd.s32 4294967294, %s2298_s24   ;;  %s2298_s24 = sphi %s2359_s24, %s2791_s24   ;;  %s2294_s23 = sphi %s2357_s23, %s2790_s23   ;;  %s2290_s22 = sphi %s2355_s22, %s2789_s22   ;;  %s2286_s21 = sphi %s2353_s21, %s2788_s21  }
   0x9   : > { %p47_p0 = scmp.ne.s32.totalorder %s2290_s22, %s2286_s21  ;;  %p2772_p1 = scmp.eq.s32.totalorder %s2374_s25, 0 }
   0xa   : > { %p161_p3 = scmp.eq.s32.totalorder %s1853_s26, 1  ;;  %p1854_p5 = scmp.ge.s32.totalorder %s2298_s24, 1 }
   0xb   : > { %p2383_p4 = por %p2772_p1, %p47_p0  ;;  %p194_p7 = scmp.lt.s32.totalorder %s2298_s24, 3 }
   0xc   : > { %p2388_p6 = por %p161_p3, %p47_p0  ;;  %s2300_s30 = smov [#allocation5]  }
   0xd   : > { %s2775_s27 = scalar_select %p2383_p4, 1, 0 }
   0xe   : > { %s2776_s28 = scalar_select %p2388_p6, 1, 0 }
   0xf   : > { %p2393_p8 = pnand %p1854_p5, %p194_p7  ;;  %s206_s7 = sshll.u32 %s2300_s30, 4  ;;  %s2397_s7 = int_to_ptr.vmem [resolvable:$true] %s206_s7 }
  0x10   : > { %s2301_s9 = smov [#allocation7]   ;;  %s2110_s13 = scalar_lea.hbm %s2766_s1, 896 }
  0x11   : > { %p2018_p9 = pneg %p2393_p8  ;;  %s222_s10 = sshll.u32 %s2301_s9, 4  ;;  %s2408_s10 = int_to_ptr.vmem [resolvable:$true] %s222_s10 }
  0x12   : > { %p2111_p12 = scmp.ne.s32.totalorder %s2766_s1, %s2110_s13  ;;  %p2117_p5 = scmp.lt.u32.totalorder %s2110_s13, %s2766_s1 }
  0x13   : > { %p2404_p11 = pnand %p2018_p9, %p2772_p1 }
  0x15   : > { %p2112_p13 = pneg %p2404_p11 }
  0x17   : > { %p2113_p0 = pnand %p2112_p13, %p2111_p12 }
  0x19   : > { %p2114_p3 = pneg %p2113_p0 }
  0x1b   : > { %p2119_p7 = pnand %p2117_p5, %p2114_p3 }
  0x1d   : > { %2122 = shalt.err (!%p2119_p7)
}
  0x1e   : > { %s2123_s18 = scalar_lea.vmem %s2397_s7, 896  ;;  %p2131_p2 = scmp.lt.s32.totalorder %s2397_s7, %s2397_s7 }
  0x1f   : > { %p2124_p9 = scmp.ne.s32.totalorder %s2397_s7, %s2123_s18  ;;  %p2132_p12 = scmp.lt.s32.totalorder %s2123_s18, %s2123_s18 }
  0x21   : > { %p2126_p10 = pnand %p2124_p9, %p2112_p13  ;;  %p2133_p0 = por %p2132_p12, %p2131_p2 }
  0x23   : > { %p2127_p1 = pneg %p2126_p10 }
  0x25   : > { %p2134_p6 = pnand %p2133_p0, %p2127_p1 }
  0x27   : > { %2137 = shalt.err (!%p2134_p6)
}
  0x28   : > { %s2302_s19 = smov 128   ;;  %s2303_s20 = smov 8  }
  0x29   : > { %2021 = dma.hbm_to_vmem [thread:$0]  (!%p2404_p11), %s2766_s1, 896, %s2397_s7, [#allocation6], %s2302_s19, %s2302_s19, %s2303_s20  }
  0x2a   : > { %s2138_s12 = scalar_lea.hbm %s2768_s3, 896 }
  0x2b   : > { %p2139_p2 = scmp.ne.s32.totalorder %s2768_s3, %s2138_s12  ;;  %p2145_p10 = scmp.lt.u32.totalorder %s2138_s12, %s2768_s3 }
  0x2d   : > { %p2141_p1 = pnand %p2139_p2, %p2112_p13 }
  0x2f   : > { %p2142_p6 = pneg %p2141_p1 }
  0x31   : > { %p2147_p3 = pnand %p2145_p10, %p2142_p6 }
  0x33   : > { %2150 = shalt.err (!%p2147_p3)
}
  0x34   : > { %s2151_s7 = scalar_lea.vmem %s2408_s10, 896  ;;  %p2159_p12 = scmp.lt.s32.totalorder %s2408_s10, %s2408_s10 }
  0x35   : > { %p2152_p5 = scmp.ne.s32.totalorder %s2408_s10, %s2151_s7  ;;  %p2160_p0 = scmp.lt.s32.totalorder %s2151_s7, %s2151_s7 }
  0x37   : > { %p2154_p7 = pnand %p2152_p5, %p2112_p13  ;;  %p2161_p2 = por %p2160_p0, %p2159_p12 }
  0x39   : > { %p2155_p9 = pneg %p2154_p7 }
  0x3b   : > { %p2162_p1 = pnand %p2161_p2, %p2155_p9 }
  0x3d   : > { %2165 = shalt.err (!%p2162_p1)
}
  0x3e   : > { %2024 = dma.hbm_to_vmem [thread:$0]  (!%p2404_p11), %s2768_s3, 896, %s2408_s10, [#allocation6], %s2302_s19, %s2302_s19, %s2303_s20  }
  0x3f   : > { %s2463_s26 = sadd.s32 1, %s2298_s24   ;;  %s34_s8 = sadd.s32 1, %s2294_s23 }
  0x40   : > { %s31_s30 = ssub.s32 %s2298_s24, %s2463_s26  ;;  %p41_p13 = scmp.ne.s32.totalorder %s2294_s23, %s2290_s22 }
  0x41   : > { %p32_p6 = scmp.eq.s32.totalorder %s31_s30, 0  ;;  %p42_p10 = scmp.eq.s32.totalorder %s2298_s24, 0 }
  0x42   : > { %p2779_p3 = scmp.eq.s32.totalorder %s2374_s25, 1  ;;  %p2038_p7 = scmp.lt.s32.totalorder %s2298_s24, 2 }
  0x43   : > { %s2479_s11 = scalar_select %p32_p6, %s2294_s23, %s34_s8  }
  0x44   : > { %p2473_p5 = por %p2779_p3, %p41_p13  ;;  %p43_p9 = por %p42_p10, %p41_p13 }
  0x45   : > { %s239_s12 = sand.u32 1, %s2294_s23   ;;  %s1920_s10 = sshll.u32 %s2298_s24, 8 }
  0x46   : > { %s2780_s9 = scalar_select %p2473_p5, 1, 0 }
  0x47   : > { %s1858_s13 = sshll.u32 %s239_s12, 4  ;;  %s2486_s14 = scalar_lea.hbm %s2765_s0, %s1920_s10 }
  0x48   : > { %s243_s15 = scalar_lea.vmem [#allocation2], %s1858_s13  ;;  %p2490_p11 = pnand %p2038_p7, %p43_p9 }
  0x49   : > { %s251_s16 = sshll.u32 %s243_s15, 4  ;;  %s240_s17 = scalar_lea.sflag [#allocation3], %s239_s12  ;;  %s2488_s16 = int_to_ptr.vmem [resolvable:$true] %s251_s16 }
  0x4a   : > { %s2166_s18 = scalar_lea.hbm %s2486_s14, 256  ;;  %p2168_p0 = pneg %p2490_p11 }
  0x4b   : > { %p2167_p12 = scmp.ne.s32.totalorder %s2486_s14, %s2166_s18  ;;  %s2171_s13 = scalar_lea.hbm %s2765_s0, 512 }
  0x4c   : > { %p2172_p13 = scmp.lt.u32.totalorder %s2486_s14, %s2765_s0  ;;  %p2173_p6 = scmp.lt.u32.totalorder %s2171_s13, %s2166_s18 }
  0x4d   : > { %p2169_p2 = pnand %p2168_p0, %p2167_p12  ;;  %p2175_p3 = scmp.lt.u32.totalorder %s2166_s18, %s2486_s14 }
  0x4e   : > { %p2174_p10 = por %p2173_p6, %p2172_p13 }
  0x4f   : > { %p2170_p1 = pneg %p2169_p2 }
  0x50   : > { %p2176_p7 = por %p2175_p3, %p2174_p10 }
  0x52   : > { %p2177_p9 = pnand %p2176_p7, %p2170_p1 }
  0x54   : > { %2180 = shalt.err (!%p2177_p9)
}
  0x55   : > { %s2181_s12 = scalar_lea.vmem %s2488_s16, 256  ;;  %s2304_s20 = smov [#allocation2]  }
  0x56   : > { %p2182_p12 = scmp.ne.s32.totalorder %s2488_s16, %s2181_s12  ;;  %s2186_s15 = sshll.u32 %s2304_s20, 4  ;;  %s2187_s15 = int_to_ptr.vmem [resolvable:$false] %s2186_s15 }
  0x57   : > { %s2188_s8 = scalar_lea.vmem %s2187_s15, 512  ;;  %p2189_p4 = scmp.lt.s32.totalorder %s2488_s16, %s2187_s15 }
  0x58   : > { %p2184_p2 = pnand %p2182_p12, %p2168_p0  ;;  %p2190_p13 = scmp.lt.s32.totalorder %s2188_s8, %s2181_s12 }
  0x5a   : > { %p2185_p5 = pneg %p2184_p2  ;;  %p2191_p6 = por %p2190_p13, %p2189_p4 }
  0x5c   : > { %p2192_p10 = pnand %p2191_p6, %p2185_p5 }
  0x5e   : > { %2195 = shalt.err (!%p2192_p10)
}
  0x5f   : > { %2028 = dma.hbm_to_vmem [thread:$0]  (!%p2490_p11), %s2486_s14, 256, %s2488_s16, %s240_s17  }
  0x60   : > { %260 = sbr.rel (%p2393_p8) target bundleno = 1179 (0x49b), region = 40  ;;  %s2522_s18 = sand.u32 (!%p2393_p8), 1, %s2290_s22  }
  0x61   : > { %s1862_s30 = sshll.u32 (!%p2393_p8), %s2522_s18, 4  ;;  %s263_s13 = scalar_lea.sflag (!%p2393_p8), [#allocation3], %s2522_s18 }
  0x62   : > { %s266_s10 = scalar_lea.vmem (!%p2393_p8), [#allocation2], %s1862_s30  ;;  %p2782_p4 = scmp.ne.s32.totalorder (!%p2393_p8), %s2775_s27, 0 }
  0x67   : > { %2269 = dma.done.wait (%p2782_p4), %s263_s13, 256  }
  0x68   : > { %2271 = vsyncadd (%p2782_p4), %s263_s13, 4294967040  ;;  %p2783_p5 = scmp.eq.s32.totalorder %s2374_s25, 0 }
  0x6a   : > { %2273 = dma.done.wait (%p2783_p5), [#allocation6], 1792   ;;  %p2784_p11 = pmov %p2783_p5 }
  0x6b   : > { %v2305_v0 = vmov 0.0   ;;  %v308_v1 = vld [vmem:[%s266_s10] sm:$0xff]  ;;  %s2306_s29 = smov 127   ;;  %s2307_s14 = smov 126   ;;  %v309_v2 = vld [vmem:[%s266_s10 + $0x8] sm:$0xff]  ;;  %v2311_v3 = vmov 0   ;;  %v912_v45 = vlaneseq }
  0x6c   : > { %2275 = vsyncadd (%p2784_p11), [#allocation6], 4294965504  ;;  %391 = vmatprep.mubr.f32.mxu1 %v2305_v0  ;;  %1940 = vmatprep.subr.mxu0 %v2305_v0  ;;  %s2308_s27 = smov 125   ;;  %s2309_s16 = smov 124   ;;  %v902_v4 = vld [vmem:[%s2767_s2] sm:$0xff]  ;;  %vm319_vm0 = vcmask 1039360  }
  0x6d   : > { %315 = vrot.lane.b32.xlu0 %v308_v1, %s2306_s29  ;;  %474 = vrot.lane.b32.xlu1 %v308_v1, %s2307_s14  ;;  %s2310_s7 = smov 123   ;;  %s2312_s17 = smov 122   ;;  %v312_v8 = vld [vmem:[#allocation5 + $0x8] sm:$0xff]  ;;  %vm323_vm1 = vcmask 64512   ;;  %vm478_vm2 = vcmask 1031168   ;;  %v310_v11 = vld [vmem:[#allocation5] sm:$0xff] }
  0x6e   : > { %2089 = vset.pattern.permute.xlu0 %v2311_v3  ;;  %vm564_vm3 = vcmask 1022976   ;;  %v473_v15 = vld [vmem:[#allocation5 + $0x10] sm:$0xff]  ;;  %vm650_vm4 = vcmask 1014784   ;;  %v559_v19 = vld [vmem:[#allocation5 + $0x18] sm:$0xff]  ;;  %vm736_vm5 = vcmask 1006592   ;;  %v645_v23 = vld [vmem:[#allocation5 + $0x20] sm:$0xff] }
  0x6f   : > { %vm822_vm6 = vcmask 998400   ;;  %v731_v27 = vld [vmem:[#allocation5 + $0x28] sm:$0xff]  ;;  %v817_v29 = vld [vmem:[#allocation5 + $0x30] sm:$0xff]  ;;  %v2578_v49 = vand.u32 127, %v912_v45  ;;  %vm2313_vm7 = vmmov 0   ;;  %v923_v57 = vld [vmem:[#allocation7] sm:$0xff] }
  0x70   : > { %1942 = vmatprep.mubr.msk.f32.mxu0 %vm2313_vm7, %v2305_v0  ;;  %v1508_v60 = vld [vmem:[%s2769_s4] sm:$0xff]  ;;  %s1865_s8 = sshll.u32 %s2522_s18, 3  ;;  %s1916_s13 = sshll.u32 %s2374_s25, 7 }
  0x71   : > { %317 = vrot.lane.b32.xlu0 %v309_v2, %s2306_s29  ;;  %476 = vrot.lane.b32.xlu1 %v309_v2, %s2307_s14  ;;  %vm915_vm8 = vcmp.ge.s32.totalorder %v2578_v49, 5  ;;  %vm917_vm9 = vcmp.lt.s32.totalorder %v2578_v49, 69  ;;  %v925_v63 = vld [vmem:[#allocation7 + $0x8] sm:$0xff]  ;;  %s300_s30 = scalar_lea.vmem [#allocation8], %s1865_s8  ;;  %p2785_p0 = scmp.ne.s32.totalorder %s2780_s9, 0 }
  0x72   : > { %vm919_vm10 = vmand %vm915_vm8, %vm917_vm9 }
  0x75   : > { %562 = vrot.lane.b32.xlu1 %v309_v2, %s2308_s27  ;;  %560 = vrot.lane.b32.xlu0 %v308_v1, %s2308_s27 }
  0x79   : > { %648 = vrot.lane.b32.xlu1 %v309_v2, %s2309_s16  ;;  %646 = vrot.lane.b32.xlu0 %v308_v1, %s2309_s16 }
  0x7d   : > { %734 = vrot.lane.b32.xlu1 %v309_v2, %s2310_s7  ;;  %732 = vrot.lane.b32.xlu0 %v308_v1, %s2310_s7 }
  0x81   : > { %820 = vrot.lane.b32.xlu1 %v309_v2, %s2312_s17  ;;  %818 = vrot.lane.b32.xlu0 %v308_v1, %s2312_s17 }
  0x85   : > { %905 = vperm.xlu0 %2089, %v902_v4   ;;  %930 = vrot.lane.b32.xlu1 %v2305_v0, %s2306_s29 }
  0x89   : > { %1087 = vrot.lane.b32.xlu1 %v2305_v0, %s2307_s14 }
  0x8d   : > { %1172 = vrot.lane.b32.xlu1 %v2305_v0, %s2308_s27 }
  0xdf   : > { %v316_v5 = vpop.permute.xlu0 %315  ;;  %v475_v6 = vpop.permute.xlu1 %474 }
  0xe3   : > { %v318_v7 = vpop.permute.xlu0 %317  ;;  %v477_v9 = vpop.permute.xlu1 %476 }
  0xe4   : > { %327 = vmatprep.subr.mxu1 %v318_v7  ;;  %v320_v10 = vsel %vm319_vm0, %v316_v5, %v318_v7  ;;  %v479_v14 = vsel %vm478_vm2, %v475_v6, %v477_v9  ;;  %v1084_v5 = vld [vmem:[#allocation7 + $0x10] sm:$0xff]  ;;  %v1169_v6 = vld [vmem:[#allocation7 + $0x18] sm:$0xff] }
  0xe5   : > { %328 = vmatpush1.msra.mxu1 %v320_v10  ;;  %v1254_v10 = vld [vmem:[#allocation7 + $0x20] sm:$0xff] }
  0xe6   : > { %1867 = vmatmul.mubr.msk.f32.vlgmr.msra.gmra.mrb[0].mxu1 %vm323_vm1, %v312_v8  ;;  %401 = vmatprep.subr.mxu1 %v309_v2 }
  0xe7   : > { %402 = vmatpush1.msra.mxu1 %v308_v1  ;;  %465 = vmatprep.mubr.f32.mxu1 %v2305_v0  ;;  %v563_v12 = vpop.permute.xlu1 %562  ;;  %v561_v13 = vpop.permute.xlu0 %560 }
  0xe8   : > { %485 = vmatprep.subr.mxu1 %v477_v9  ;;  %v565_v18 = vsel %vm564_vm3, %v561_v13, %v563_v12 }
  0xea   : > { %1868 = vmatmul.mubr.msk.f32.vlgmr.msra.gmra.mrb[2].mxu1 %vm323_vm1, %v310_v11 }
  0xeb   : > { %486 = vmatpush1.msra.mxu1 %v479_v14  ;;  %549 = vmatprep.mubr.f32.mxu1 %v2305_v0  ;;  %v649_v16 = vpop.permute.xlu1 %648  ;;  %v647_v17 = vpop.permute.xlu0 %646  ;;  %v1339_v14 = vld [vmem:[#allocation7 + $0x28] sm:$0xff] }
  0xec   : > { %571 = vmatprep.subr.mxu1 %v563_v12  ;;  %v651_v22 = vsel %vm650_vm4, %v647_v17, %v649_v16  ;;  %v1424_v17 = vld [vmem:[#allocation7 + $0x30] sm:$0xff] }
  0xee   : > { %1869 = vmatmul.mubr.msk.f32.vlgmr.msra.gmra.mrb[4].mxu1 %vm323_vm1, %v473_v15 }
  0xef   : > { %572 = vmatpush1.msra.mxu1 %v565_v18  ;;  %635 = vmatprep.mubr.f32.mxu1 %v2305_v0  ;;  %v735_v20 = vpop.permute.xlu1 %734  ;;  %v733_v21 = vpop.permute.xlu0 %732 }
  0xf0   : > { %657 = vmatprep.subr.mxu1 %v649_v16  ;;  %v737_v24 = vsel %vm736_vm5, %v733_v21, %v735_v20  ;;  %v2620_v21 = vshrl.u32 %v912_v45, 7 }
  0xf2   : > { %1870 = vmatmul.mubr.msk.f32.vlgmr.msra.gmra.mrb[6].mxu1 %vm323_vm1, %v559_v19 }
  0xf3   : > { %658 = vmatpush1.msra.mxu1 %v651_v22  ;;  %721 = vmatprep.mubr.f32.mxu1 %v2305_v0  ;;  %v821_v25 = vpop.permute.xlu1 %820  ;;  %v819_v26 = vpop.permute.xlu0 %818  ;;  %v2623_v22 = vmul.u32 2, %v2578_v49 }
  0xf4   : > { %743 = vmatprep.subr.mxu1 %v735_v20  ;;  %v823_v28 = vsel %vm822_vm6, %v819_v26, %v821_v25  ;;  %v1566_v26 = vadd.s32 24, %v2620_v21 }
  0xf5   : > { %vm1580_vm11 = vcmp.eq.s32.totalorder %v2620_v21, %v2623_v22 }
  0xf6   : > { %1871 = vmatmul.mubr.msk.f32.vlgmr.msra.gmra.mrb[8].mxu1 %vm323_vm1, %v645_v23  ;;  %v1564_v23 = vadd.s32 8, %v2620_v21  ;;  %vm1583_vm15 = vcmp.eq.s32.totalorder %v1566_v26, %v2623_v22 }
  0xf7   : > { %744 = vmatpush1.msra.mxu1 %v737_v24  ;;  %807 = vmatprep.mubr.f32.mxu1 %v2305_v0  ;;  %v931_v30 = vpop.permute.xlu1 %930  ;;  %v2314_v24 = vmov 0.0|0.0  }
  0xf8   : > { %829 = vmatprep.subr.mxu1 %v821_v25  ;;  %v1565_v25 = vadd.s32 16, %v2620_v21  ;;  %vm1581_vm12 = vcmp.eq.s32.totalorder %v1564_v23, %v2623_v22 }
  0xf9   : > { %vm1981_vm13 = vmpackc.low %vm1581_vm12, %vm1580_vm11 }
  0xfa   : > { %1872 = vmatmul.mubr.msk.f32.vlgmr.msra.gmra.mrb[10].mxu1 %vm323_vm1, %v731_v27  ;;  %v1567_v27 = vadd.s32 32, %v2620_v21  ;;  %vm1582_vm14 = vcmp.eq.s32.totalorder %v1565_v25, %v2623_v22 }
  0xfb   : > { %830 = vmatpush1.msra.mxu1 %v823_v28  ;;  %893 = vmatprep.mubr.f32.mxu1 %v2305_v0  ;;  %v1088_v54 = vpop.permute.xlu1 %1087  ;;  %v1568_v28 = vadd.s32 40, %v2620_v21 }
  0xfc   : > { %938 = vmatprep.subr.mxu1 %v931_v30 }
  0xfe   : > { %1873 = vmatmul.mubr.msk.f32.vlgmr.msra.gmra.mrb[12].mxu1 %vm323_vm1, %v817_v29  ;;  %v2315_v29 = vmov 1.0|1.0  }
  0xff   : > { %1002 = vmatprep.mubr.f32.mxu1 %v2305_v0  ;;  %v1173_v59 = vpop.permute.xlu1 %1172 }
 0x104   : > { %v906_v51 = vpop.permute.xlu0 %905 }
 0x1b9   : > { %v393_v31 = vpop.f32.mrb[0].mxu1 }
 0x1ba   : > { %v395_v32 = vpop.f32.mrb[1].mxu1 }
 0x1bb   : > { %v1571_v32 = vadd.s32 64, %v2620_v21 }
 0x1bd   : > { %v467_v33 = vpop.f32.mrb[2].mxu1  ;;  %vm1588_vm11 = vcmp.eq.s32.totalorder %v1571_v32, %v2623_v22 }
 0x1be   : > { %v468_v34 = vadd.f32 %v467_v33, %v393_v31  ;;  %v469_v35 = vpop.f32.mrb[3].mxu1  ;;  %v1570_v31 = vadd.s32 56, %v2620_v21  ;;  %v1572_v33 = vadd.s32 72, %v2620_v21 }
 0x1c0   : > { %vm1587_vm9 = vcmp.eq.s32.totalorder %v1570_v31, %v2623_v22  ;;  %vm1589_vm12 = vcmp.eq.s32.totalorder %v1572_v33, %v2623_v22 }
 0x1c1   : > { %v551_v36 = vpop.f32.mrb[4].mxu1 }
 0x1c2   : > { %v556_v37 = vadd.f32 %v551_v36, %v468_v34  ;;  %v553_v38 = vpop.f32.mrb[5].mxu1 }
 0x1c5   : > { %v637_v39 = vpop.f32.mrb[6].mxu1 }
 0x1c6   : > { %v642_v40 = vadd.f32 %v637_v39, %v556_v37  ;;  %v639_v41 = vpop.f32.mrb[7].mxu1 }
 0x1c9   : > { %v723_v42 = vpop.f32.mrb[8].mxu1 }
 0x1ca   : > { %v728_v43 = vadd.f32 %v723_v42, %v642_v40  ;;  %v725_v44 = vpop.f32.mrb[9].mxu1 }
 0x1cd   : > { %v809_v46 = vpop.f32.mrb[10].mxu1 }
 0x1ce   : > { %v814_v47 = vadd.f32 %v809_v46, %v728_v43  ;;  %v811_v48 = vpop.f32.mrb[11].mxu1  ;;  %v1573_v46 = vadd.s32 80, %v2620_v21 }
 0x1d1   : > { %v895_v50 = vpop.f32.mrb[12].mxu1 }
 0x1d2   : > { %v900_v52 = vadd.f32 %v895_v50, %v814_v47  ;;  %v897_v53 = vpop.f32.mrb[13].mxu1  ;;  %v1574_v47 = vadd.s32 88, %v2620_v21 }
 0x1d3   : > { %v1576_v53 = vadd.s32 104, %v2620_v21 }
 0x1d4   : > { %v908_v55 = vadd.f32 %v906_v51, %v900_v52  ;;  %v1575_v52 = vadd.s32 96, %v2620_v21 }
 0x1d6   : > { %v910_v56 = vmax.f32 %v908_v55, 0.0 }
 0x1d8   : > { %v921_v58 = vsel %vm919_vm10, %v910_v56, 0.0  ;;  %1941 = vmatpush3.msk.msra.mxu0 %vm919_vm10, %v910_v56 }
 0x1d9   : > { %1085 = vrot.lane.b32.xlu0 %v921_v58, %s2307_s14  ;;  %928 = vrot.lane.b32.xlu1 %v921_v58, %s2306_s29 }
 0x1da   : > { %1180 = vmatprep.subr.mxu0 %v1173_v59  ;;  %1943 = vmatmul.mubr.msk.f32.vlgmr.msra.gmra.mrb[0].mxu0 %vm323_vm1, %v923_v57 }
 0x1db   : > { %1244 = vmatprep.mubr.f32.mxu0 %v2305_v0 }
 0x1dd   : > { %1170 = vrot.lane.b32.xlu0 %v921_v58, %s2308_s27  ;;  %1257 = vrot.lane.b32.xlu1 %v2305_v0, %s2309_s16 }
 0x1e1   : > { %1255 = vrot.lane.b32.xlu0 %v921_v58, %s2309_s16  ;;  %1342 = vrot.lane.b32.xlu1 %v2305_v0, %s2310_s7 }
 0x1e5   : > { %1340 = vrot.lane.b32.xlu0 %v921_v58, %s2310_s7  ;;  %1427 = vrot.lane.b32.xlu1 %v2305_v0, %s2312_s17 }
 0x1e9   : > { %1425 = vrot.lane.b32.xlu0 %v921_v58, %s2312_s17  ;;  %v1577_v58 = vadd.s32 112, %v2620_v21  ;;  %s2316_s17 = smov [#allocation8]  }
 0x1ea   : > { %s2200_s19 = sshll.u32 %s2316_s17, 4  ;;  %s2201_s19 = int_to_ptr.vmem [resolvable:$false] %s2200_s19 }
 0x1eb   : > { %s2202_s12 = scalar_lea.vmem %s2201_s19, 256 }
 0x1ed   : > { %1511 = vperm.xlu0 %2089, %v1508_v60  }
 0x24b   : > { %v1086_v61 = vpop.permute.xlu0 %1085  ;;  %v929_v62 = vpop.permute.xlu1 %928 }
 0x24c   : > { %v932_v1 = vsel %vm319_vm0, %v929_v62, %v931_v30  ;;  %v1089_v2 = vsel %vm478_vm2, %v1086_v61, %v1088_v54  ;;  %v1569_v30 = vadd.s32 48, %v2620_v21 }
 0x24d   : > { %939 = vmatpush1.msra.mxu1 %v932_v1 }
 0x24e   : > { %1095 = vmatprep.subr.mxu1 %v1088_v54  ;;  %1874 = vmatmul.mubr.msk.f32.vlgmr.msra.gmra.mrb[14].mxu1 %vm323_vm1, %v925_v63  ;;  %vm1586_vm8 = vcmp.eq.s32.totalorder %v1569_v30, %v2623_v22 }
 0x24f   : > { %v1171_v3 = vpop.permute.xlu0 %1170  ;;  %1096 = vmatpush1.msra.mxu1 %v1089_v2  ;;  %v1258_v4 = vpop.permute.xlu1 %1257  ;;  %1159 = vmatprep.mubr.f32.mxu1 %v2305_v0  ;;  %vm1990_vm10 = vmpackc.low %vm1587_vm9, %vm1586_vm8  ;;  %vm1526_vm8 = vcmp.lt.s32.totalorder %v2578_v49, 66 }
 0x250   : > { %v1174_v7 = vsel %vm564_vm3, %v1171_v3, %v1173_v59  ;;  %1265 = vmatprep.subr.mxu1 %v1258_v4  ;;  %v1578_v59 = vadd.s32 120, %v2620_v21 }
 0x251   : > { %1181 = vmatpush1.msra.mxu0 %v1174_v7 }
 0x252   : > { %1877 = vmatmul.mubr.msk.f32.vlgmr.msra.gmra.mrb[16].mxu1 %vm323_vm1, %v1084_v5  ;;  %1878 = vmatmul.mubr.msk.f32.vlgmr.msra.gmra.mrb[2].mxu0 %vm323_vm1, %v1169_v6 }
 0x253   : > { %v1256_v8 = vpop.permute.xlu0 %1255  ;;  %v1343_v9 = vpop.permute.xlu1 %1342  ;;  %1329 = vmatprep.mubr.f32.mxu1 %v2305_v0  ;;  %1414 = vmatprep.mubr.f32.mxu0 %v2305_v0 }
 0x254   : > { %v1259_v11 = vsel %vm650_vm4, %v1256_v8, %v1258_v4  ;;  %1350 = vmatprep.subr.mxu0 %v1343_v9 }
 0x255   : > { %1266 = vmatpush1.msra.mxu1 %v1259_v11 }
 0x256   : > { %1879 = vmatmul.mubr.msk.f32.vlgmr.msra.gmra.mrb[18].mxu1 %vm323_vm1, %v1254_v10 }
 0x257   : > { %v1341_v12 = vpop.permute.xlu0 %1340  ;;  %v1428_v13 = vpop.permute.xlu1 %1427  ;;  %1499 = vmatprep.mubr.f32.mxu1 %v2305_v0 }
 0x258   : > { %v1344_v15 = vsel %vm736_vm5, %v1341_v12, %v1343_v9  ;;  %1435 = vmatprep.subr.mxu1 %v1428_v13  ;;  %vm1584_vm5 = vcmp.eq.s32.totalorder %v1567_v27, %v2623_v22 }
 0x259   : > { %1351 = vmatpush1.msra.mxu0 %v1344_v15 }
 0x25a   : > { %1880 = vmatmul.mubr.msk.f32.vlgmr.msra.gmra.mrb[4].mxu0 %vm323_vm1, %v1339_v14  ;;  %1980 = vmatprep.subr.bf16.mxu0 %v2314_v24 }
 0x25b   : > { %v1426_v16 = vpop.permute.xlu0 %1425  ;;  %1977 = vmatprep.mubr.msk.f32.mxu0 %vm2313_vm7, %v2305_v0  ;;  %1982 = vmatpush3.bf16.msk.msra.mxu0 %vm1981_vm13, %v2315_v29  ;;  %vm1993_vm13 = vmpackc.low %vm1589_vm12, %vm1588_vm11  ;;  %vm1594_vm11 = vcmp.eq.s32.totalorder %v1577_v58, %v2623_v22  ;;  %vm1595_vm12 = vcmp.eq.s32.totalorder %v1578_v59, %v2623_v22 }
 0x25c   : > { %v1429_v18 = vsel %vm822_vm6, %v1426_v16, %v1428_v13  ;;  %1983 = vmatprep.subr.bf16.mxu0 %v2314_v24  ;;  %vm1585_vm6 = vcmp.eq.s32.totalorder %v1568_v28, %v2623_v22 }
 0x25d   : > { %1436 = vmatpush1.msra.mxu1 %v1429_v18  ;;  %vm1987_vm7 = vmpackc.low %vm1585_vm6, %vm1584_vm5  ;;  %vm1592_vm5 = vcmp.eq.s32.totalorder %v1575_v52, %v2623_v22  ;;  %vm1593_vm6 = vcmp.eq.s32.totalorder %v1576_v53, %v2623_v22 }
 0x25e   : > { %1881 = vmatmul.mubr.msk.f32.vlgmr.msra.gmra.mrb[20].mxu1 %vm323_vm1, %v1424_v17  ;;  %vm1984_vm1 = vmpackc.low %vm1583_vm15, %vm1582_vm14  ;;  %vm1590_vm14 = vcmp.eq.s32.totalorder %v1573_v46, %v2623_v22  ;;  %vm1591_vm15 = vcmp.eq.s32.totalorder %v1574_v47, %v2623_v22 }
 0x25f   : > { %1985 = vmatpush3.bf16.msk.msra.mxu0 %vm1984_vm1, %v2315_v29  ;;  %vm1996_vm1 = vmpackc.low %vm1591_vm15, %vm1590_vm14  ;;  %vm1522_vm14 = vcmask 523264  }
 0x260   : > { %1986 = vmatprep.subr.bf16.mxu0 %v2314_v24  ;;  %vm1999_vm9 = vmpackc.low %vm1593_vm6, %vm1592_vm5 }
 0x263   : > { %1988 = vmatpush3.bf16.msk.msra.mxu0 %vm1987_vm7, %v2315_v29  ;;  %vm1524_vm7 = vcmp.ge.s32.totalorder %v2578_v49, 2 }
 0x264   : > { %1989 = vmatprep.subr.bf16.mxu0 %v2314_v24 }
 0x267   : > { %1991 = vmatpush3.bf16.msk.msra.mxu0 %vm1990_vm10, %v2315_v29  ;;  %vm1528_vm10 = vmand %vm1524_vm7, %vm1526_vm8 }
 0x268   : > { %1992 = vmatprep.subr.bf16.mxu0 %v2314_v24 }
 0x26b   : > { %1994 = vmatpush3.bf16.msk.msra.mxu0 %vm1993_vm13, %v2315_v29  ;;  %vm2002_vm13 = vmpackc.low %vm1595_vm12, %vm1594_vm11 }
 0x26c   : > { %1995 = vmatprep.subr.bf16.mxu0 %v2314_v24  ;;  %v1512_v57 = vpop.permute.xlu0 %1511 }
 0x26f   : > { %1997 = vmatpush3.bf16.msk.msra.mxu0 %vm1996_vm1, %v2315_v29 }
 0x270   : > { %1998 = vmatprep.subr.bf16.mxu0 %v2314_v24 }
 0x273   : > { %2000 = vmatpush3.bf16.msk.msra.mxu0 %vm1999_vm9, %v2315_v29 }
 0x274   : > { %2001 = vmatprep.subr.bf16.mxu0 %v2314_v24 }
 0x277   : > { %2003 = vmatpush3.bf16.msk.msra.mxu0 %vm2002_vm13, %v2315_v29 }
 0x2ad   : > { %v1078_v19 = vpop.f32.mrb[0].mxu0 }
 0x2ae   : > { %v1944_v20 = vpop.f32.mrb[1].mxu0 }
 0x321   : > { %v1004_v34 = vpop.f32.mrb[14].mxu1 }
 0x322   : > { %v1079_v35 = vadd.f32 %v1078_v19, %v1004_v34  ;;  %v1006_v36 = vpop.f32.mrb[15].mxu1 }
 0x325   : > { %v1161_v37 = vpop.f32.mrb[16].mxu1  ;;  %v1246_v38 = vpop.f32.mrb[2].mxu0 }
 0x326   : > { %v1166_v39 = vadd.f32 %v1161_v37, %v1079_v35  ;;  %v1163_v40 = vpop.f32.mrb[17].mxu1  ;;  %v1248_v41 = vpop.f32.mrb[3].mxu0 }
 0x328   : > { %v1251_v42 = vadd.f32 %v1246_v38, %v1166_v39 }
 0x329   : > { %v1331_v43 = vpop.f32.mrb[18].mxu1 }
 0x32a   : > { %v1336_v44 = vadd.f32 %v1331_v43, %v1251_v42  ;;  %v1333_v45 = vpop.f32.mrb[19].mxu1 }
 0x32d   : > { %v1416_v48 = vpop.f32.mrb[4].mxu0 }
 0x32e   : > { %v1421_v50 = vadd.f32 %v1416_v48, %v1336_v44  ;;  %v1418_v51 = vpop.f32.mrb[5].mxu0 }
 0x331   : > { %v1501_v54 = vpop.f32.mrb[20].mxu1 }
 0x332   : > { %v1506_v55 = vadd.f32 %v1501_v54, %v1421_v50  ;;  %v1503_v56 = vpop.f32.mrb[21].mxu1 }
 0x334   : > { %v1514_v60 = vadd.f32 %v1512_v57, %v1506_v55 }
 0x336   : > { %v1516_v61 = vmax.f32 %v1514_v60, 0.0 }
 0x338   : > { %v1530_v49 = vsel %vm1528_vm10, %v1516_v61, 0.0 }
 0x339   : > { %v2095_v62 = vpack.i.bf16 %v2305_v0, %v1530_v49 }
 0x33b   : > { %2096 = vrot.lane.b32.xlu0 %v2095_v62, %s2307_s14  ;;  %2091 = vrot.lane.b32.xlu1 %v2095_v62, %s2306_s29 }
 0x33f   : > { %2106 = vrot.lane.b32.xlu0 %v2095_v62, %s2309_s16  ;;  %2101 = vrot.lane.b32.xlu1 %v2095_v62, %s2308_s27  ;;  %s1719_s27 = sshll.u32 %s300_s30, 4  ;;  %s1701_s16 = scalar_lea.sflag [#allocation4], %s2522_s18  ;;  %s1720_s27 = int_to_ptr.vmem [resolvable:$true] %s1719_s27 }
 0x340   : > { %s2196_s7 = scalar_lea.vmem %s1720_s27, 128  ;;  %p2203_p7 = scmp.lt.s32.totalorder %s1720_s27, %s2201_s19 }
 0x341   : > { %p2197_p8 = scmp.ne.s32.totalorder %s1720_s27, %s2196_s7  ;;  %p2204_p9 = scmp.lt.s32.totalorder %s2202_s12, %s2196_s7 }
 0x343   : > { %1519 = vrot.lane.b32.xlu1 %v1516_v61, %s2307_s14  ;;  %s2694_s14 = scalar_lea.hbm %s2770_s5, %s1916_s13  ;;  %p2198_p1 = pnand %p2197_p8, %p2785_p0 }
 0x344   : > { %p2205_p12 = por %p2204_p9, %p2203_p7 }
 0x345   : > { %p2199_p3 = pneg %p2198_p1 }
 0x347   : > { %p2206_p2 = pnand %p2205_p12, %p2199_p3 }
 0x3ad   : > { %v2097_v63 = vpop.permute.xlu0 %2096  ;;  %v2092_v1 = vpop.permute.xlu1 %2091 }
 0x3ae   : > { %v2099_v2 = vunpack.i.h.bf16 %v2097_v63  ;;  %v2098_v3 = vunpack.i.l.bf16 %v2097_v63  ;;  %v2094_v4 = vunpack.i.h.bf16 %v2092_v1  ;;  %v2093_v5 = vunpack.i.l.bf16 %v2092_v1 }
 0x3b0   : > { %v1538_v6 = vsel %vm319_vm0, %v2093_v5, %v2094_v4  ;;  %v1545_v0 = vsel %vm478_vm2, %v2098_v3, %v2099_v2 }
 0x3b1   : > { %v1540_v7 = vmax.f32 %v1530_v49, %v1538_v6  ;;  %v2107_v8 = vpop.permute.xlu0 %2106  ;;  %v2102_v9 = vpop.permute.xlu1 %2101 }
 0x3b2   : > { %v2109_v10 = vunpack.i.h.bf16 %v2107_v8  ;;  %v2108_v11 = vunpack.i.l.bf16 %v2107_v8  ;;  %v2104_v12 = vunpack.i.h.bf16 %v2102_v9  ;;  %v2103_v13 = vunpack.i.l.bf16 %v2102_v9 }
 0x3b3   : > { %v1547_v14 = vmax.f32 %v1540_v7, %v1545_v0 }
 0x3b4   : > { %v1552_v15 = vsel %vm564_vm3, %v2103_v13, %v2104_v12  ;;  %v1559_v18 = vsel %vm650_vm4, %v2108_v11, %v2109_v10 }
 0x3b5   : > { %v1554_v16 = vmax.f32 %v1547_v14, %v1552_v15  ;;  %v1520_v17 = vpop.permute.xlu1 %1519 }
 0x3b6   : > { %1523 = vst.msk [vmem:[%s300_s30] sm:$0xff] %vm1522_vm14, %v1520_v17 }
 0x3b7   : > { %v1561_v19 = vmax.f32 %v1554_v16, %v1559_v18 }
 0x3b9   : > { %1978 = vmatmul.mubr.f32.vlgmr.msra.gmra.mrb[6].mxu0 %v1561_v19 }
 0x3ba   : > { %2209 = shalt.err (!%p2206_p2)
}
 0x3bb   : > { %s2210_s20 = scalar_lea.hbm %s2694_s14, 128  ;;  %s2214_s10 = scalar_lea.hbm %s2770_s5, 256 }
 0x3bc   : > { %p2211_p13 = scmp.ne.s32.totalorder %s2694_s14, %s2210_s20  ;;  %p2215_p4 = scmp.lt.u32.totalorder %s2694_s14, %s2770_s5 }
 0x3bd   : > { %p2216_p5 = scmp.lt.u32.totalorder %s2214_s10, %s2210_s20  ;;  %p2218_p8 = scmp.lt.u32.totalorder %s2210_s20, %s2694_s14 }
 0x3be   : > { %p2212_p6 = pnand %p2211_p13, %p2785_p0 }
 0x3bf   : > { %p2217_p11 = por %p2216_p5, %p2215_p4 }
 0x3c0   : > { %p2213_p10 = pneg %p2212_p6 }
 0x3c1   : > { %p2219_p1 = por %p2218_p8, %p2217_p11 }
 0x3c3   : > { %p2220_p3 = pnand %p2219_p1, %p2213_p10 }
 0x3c5   : > { %2223 = shalt.err (!%p2220_p3)
}
 0x3c6   : > { %2014 = dma.vmem_to_hbm [thread:$0]  (%p2785_p0), %s1720_s27, 128, %s2694_s14, %s1701_s16   ;;  %vm1698_vm0 = vcmask 261120  }
 0x3c7   : > { %s307_s7 = scalar_lea.vmem [#allocation9], %s1865_s8  ;;  %s2721_s20 = scalar_lea.hbm %s2771_s6, %s1916_s13 }
 0x3c8   : > { %s1732_s19 = sshll.u32 %s307_s7, 4  ;;  %s1706_s30 = scalar_lea.sflag [#allocation10], %s2522_s18  ;;  %s2723_s19 = int_to_ptr.vmem [resolvable:$true] %s1732_s19 }
 0x3c9   : > { %s2224_s14 = scalar_lea.vmem %s2723_s19, 128  ;;  %s2317_s25 = smov [#allocation9]  }
 0x3ca   : > { %p2225_p7 = scmp.ne.s32.totalorder %s2723_s19, %s2224_s14  ;;  %s2228_s8 = sshll.u32 %s2317_s25, 4  ;;  %s2229_s8 = int_to_ptr.vmem [resolvable:$false] %s2228_s8 }
 0x3cb   : > { %s2230_s27 = scalar_lea.vmem %s2229_s8, 256  ;;  %p2231_p2 = scmp.lt.s32.totalorder %s2723_s19, %s2229_s8 }
 0x3cc   : > { %p2226_p9 = pnand %p2225_p7, %p2785_p0  ;;  %p2232_p13 = scmp.lt.s32.totalorder %s2230_s27, %s2224_s14 }
 0x3ce   : > { %p2227_p12 = pneg %p2226_p9  ;;  %p2233_p6 = por %p2232_p13, %p2231_p2 }
 0x3d0   : > { %p2234_p10 = pnand %p2233_p6, %p2227_p12 }
 0x48c   : > { %v1694_v20 = vpop.f32.mrb[6].mxu0 }
 0x48d   : > { %1699 = vst.msk [vmem:[%s307_s7] sm:$0xff] %vm1698_vm0, %v1694_v20  ;;  %v1979_v21 = vpop.f32.mrb[7].mxu0 }
 0x48e   : > { %2237 = shalt.err (!%p2234_p10)
}
 0x48f   : > { %s2238_s18 = scalar_lea.hbm %s2721_s20, 128  ;;  %s2242_s10 = scalar_lea.hbm %s2771_s6, 256 }
 0x490   : > { %p2239_p4 = scmp.ne.s32.totalorder %s2721_s20, %s2238_s18  ;;  %p2243_p8 = scmp.lt.u32.totalorder %s2721_s20, %s2771_s6 }
 0x491   : > { %p2244_p1 = scmp.lt.u32.totalorder %s2242_s10, %s2238_s18  ;;  %p2246_p7 = scmp.lt.u32.totalorder %s2238_s18, %s2721_s20 }
 0x492   : > { %p2240_p5 = pnand %p2239_p4, %p2785_p0 }
 0x493   : > { %p2245_p3 = por %p2244_p1, %p2243_p8 }
 0x494   : > { %p2241_p11 = pneg %p2240_p5 }
 0x495   : > { %p2247_p9 = por %p2246_p7, %p2245_p3 }
 0x497   : > { %p2248_p12 = pnand %p2247_p9, %p2241_p11 }
 0x499   : > { %2251 = shalt.err (!%p2248_p12)
}
 0x49a   : > { %2015 = dma.vmem_to_hbm [thread:$0]  (%p2785_p0), %s2723_s19, 128, %s2721_s20, %s1706_s30  }
 0x49b PF: > { %s1744_s7 = sand.u32 1, %s2286_s21   ;;  %p2786_p2 = scmp.ne.s32.totalorder %s2776_s28, 0 }
 0x49c   : > { %p2787_p13 = scmp.ge.s32.totalorder %s2298_s24, 2  ;;  %s1745_s12 = scalar_lea.sflag [#allocation4], %s1744_s7 }
 0x49e   : > { %p2030_p6 = pnand %p2787_p13, %p2786_p2 }
 0x4a0   : > { %2277 = dma.done.wait (!%p2030_p6), %s1745_s12, 128  }
 0x4a1   : > { %2279 = vsyncadd (!%p2030_p6), %s1745_s12, 4294967168  ;;  %s1754_s15 = scalar_lea.sflag [#allocation10], %s1744_s7 }
 0x4a2   : > { %2281 = dma.done.wait (!%p2030_p6), %s1754_s15, 128  }
 0x4a3   : > { %2283 = vsyncadd (!%p2030_p6), %s1754_s15, 4294967168  ;;  %p24_p0 = scmp.ge.s32.totalorder %s2463_s26, 4   ;;  %s2788_s21 = smov %s2290_s22 }
 0x4a4   : > { %s2789_s22 = smov %s2294_s23  ;;  %s2790_s23 = smov %s2479_s11 }
 0x4a5   : > { %s2791_s24 = smov %s2463_s26  ;;  %26 = sbr.rel (!%p24_p0) target bundleno = 8 (0x8), region = 122 }
 0x4ac   :  { %1759 = vsyncpa [#allocation3], 1 }
 0x4ad   :  { %1761 = vsyncpa [#allocation3 + $0x1], 1 }
 0x4ae   :  { %1762 = vsyncpa [#allocation6], 1 }
 0x4af   :  { %1763 = vsyncpa [#allocation4], 1 }
 0x4b0   :  { %1765 = vsyncpa [#allocation4 + $0x1], 1 }
 0x4b1   :  { %1766 = vsyncpa [#allocation10], 1 }
 0x4b2   :  { %1768 = vsyncpa [#allocation10 + $0x1], 1 }

</bundles_post_ra>
